<compile_context>
chip_gen: v7x
topology: tpu7x:2x2x1
jax: 0.10.0
libtpu: 0.0.40
codegen_flags: <defaults>
</compile_context>

<pallas_src>
import jax
import jax.numpy as jnp
from jax.experimental import pallas as pl
from jax.experimental.pallas import tpu as pltpu

EPS = 1e-6


def _grad_mag(x, up, dn):
    """x, up, dn: (R, W) f32. up/dn are the row-above / row-below neighbors (replicate at edges)."""
    # Horizontal neighbors with replicate padding at the left/right column edges.
    left = jnp.concatenate([x[:, :1], x[:, :-1]], axis=1)
    right = jnp.concatenate([x[:, 1:], x[:, -1:]], axis=1)
    gx = 0.5 * (right - left)
    gy = 0.5 * (up - dn)
    return jnp.sqrt(gx * gx + gy * gy + EPS)


def _grad_norm_tiled_kernel(x_ref, up_ref, dn_ref, o_ref):
    # x_ref : VMEM (TILE_H, W) current row tile
    # up_ref: VMEM (8, W) aligned 8-row block containing the row just above the tile (clamped)
    # dn_ref: VMEM (8, W) aligned 8-row block containing the row just below the tile (clamped)
    h = pl.program_id(1)
    n_h = pl.num_programs(1)

    x = x_ref[...].astype(jnp.float32)
    up8 = up_ref[...].astype(jnp.float32)
    dn8 = dn_ref[...].astype(jnp.float32)

    # First tile: the "row above" is the tile's own row 0 (replicate), which sits at position 0
    # of the clamped halo block.  Interior tiles: the neighbor row sits at position 7.
    up_row = jnp.where(h > 0, up8[7:8, :], up8[0:1, :])
    # Last tile: the "row below" is the last image row (replicate), at position 7 of the clamped
    # halo block.  Interior tiles: the neighbor row sits at position 0.
    dn_row = jnp.where(h < n_h - 1, dn8[0:1, :], dn8[7:8, :])

    up = jnp.concatenate([up_row, x[:-1, :]], axis=0)   # row j-1 (replicate at top of image)
    dn = jnp.concatenate([x[1:, :], dn_row], axis=0)    # row j+1 (replicate at bottom of image)

    o_ref[...] = _grad_mag(x, up, dn).astype(o_ref.dtype)


def _grad_norm_plane_kernel(x_ref, o_ref):
    # Fallback: whole (H, W) plane per grid step (used when H is not a multiple of 8).
    x = x_ref[...].astype(jnp.float32)
    up = jnp.concatenate([x[:1, :], x[:-1, :]], axis=0)
    dn = jnp.concatenate([x[1:, :], x[-1:, :]], axis=0)
    o_ref[...] = _grad_mag(x, up, dn).astype(o_ref.dtype)


def _pick_tile_h(H, W, budget_bytes=2 << 20):
    """Largest row-tile (multiple of 8, divides H) whose f32 tile stays within ~budget_bytes."""
    max_rows = max(8, budget_bytes // (4 * W))
    if H <= max_rows:
        return H
    best = 8
    for d in range(8, H + 1, 8):
        if H % d == 0 and d <= max_rows:
            best = d
    return best


def gradient_norm(x: jax.Array, *, tile_h: int | None = None) -> jax.Array:
    """x: (N, C=1, H, W) -> (N, 1, H, W), same dtype. Math done in f32."""
    assert x.ndim == 4 and x.shape[1] == 1, "conv weights are [1,1,3,3] -> C must be 1"
    N, C, H, W = x.shape
    NC = N * C
    xr = x.reshape(NC, H, W)

    if H % 8 == 0:
        T = _pick_tile_h(H, W) if tile_h is None else tile_h
        assert H % T == 0 and T % 8 == 0, "tile_h must divide H and be a multiple of 8"
        n_tiles = H // T
        tb = T // 8          # main-tile size in units of 8-row halo blocks
        hb = H // 8          # number of 8-row halo blocks along H

        x_spec = pl.BlockSpec((pl.Squeezed(), T, W), lambda nc, h: (nc, h, 0))
        up_spec = pl.BlockSpec(
            (pl.Squeezed(), 8, W),
            lambda nc, h: (nc, jnp.maximum(h * tb - 1, 0), 0))
        dn_spec = pl.BlockSpec(
            (pl.Squeezed(), 8, W),
            lambda nc, h: (nc, jnp.minimum((h + 1) * tb, hb - 1), 0))
        out_spec = pl.BlockSpec((pl.Squeezed(), T, W), lambda nc, h: (nc, h, 0))

        out = pl.pallas_call(
            _grad_norm_tiled_kernel,
            out_shape=jax.ShapeDtypeStruct((NC, H, W), x.dtype),
            grid_spec=pltpu.PrefetchScalarGridSpec(
                num_scalar_prefetch=0,
                grid=(NC, n_tiles),
                in_specs=[x_spec, up_spec, dn_spec],
                out_specs=out_spec,
            ),
            compiler_params=pltpu.CompilerParams(
                dimension_semantics=("parallel", "parallel")),
        )(xr, xr, xr)
    else:
        # TODO(synk): H not a multiple of 8 falls back to one full plane per grid step
        # (no row tiling); fine for moderate image sizes.
        out = pl.pallas_call(
            _grad_norm_plane_kernel,
            out_shape=jax.ShapeDtypeStruct((NC, H, W), x.dtype),
            grid_spec=pltpu.PrefetchScalarGridSpec(
                num_scalar_prefetch=0,
                grid=(NC,),
                in_specs=[pl.BlockSpec((pl.Squeezed(), H, W), lambda nc: (nc, 0, 0))],
                out_specs=pl.BlockSpec((pl.Squeezed(), H, W), lambda nc: (nc, 0, 0)),
            ),
            compiler_params=pltpu.CompilerParams(
                dimension_semantics=("parallel",)),
        )(xr)

    return out.reshape(N, C, H, W)


def _reference(x: jax.Array) -> jax.Array:
    # Pure-JAX reference matching the PyTorch forward.
    xp = jnp.pad(x, ((0, 0), (0, 0), (1, 1), (1, 1)), mode="edge")
    gx = 0.5 * (xp[:, :, 1:-1, 2:] - xp[:, :, 1:-1, :-2])
    gy = 0.5 * (xp[:, :, :-2, 1:-1] - xp[:, :, 2:, 1:-1])
    return jnp.sqrt(gx * gx + gy * gy + EPS)


if __name__ == "__main__":
    key = jax.random.PRNGKey(0)

    # Primary test: module-consistent small shape (single row tile).
    x = jax.random.normal(key, (2, 1, 16, 16), dtype=jnp.float32)
    out = jax.block_until_ready(gradient_norm(x))
    ref = _reference(x)
    assert out.shape == x.shape and out.dtype == x.dtype
    assert jnp.allclose(out, ref, atol=1e-5, rtol=1e-5), "mismatch vs reference (single tile)"

    # Secondary test: exercise the multi-tile halo path (forced tile_h=8 over H=32).
    x2 = jax.random.normal(jax.random.PRNGKey(0), (2, 1, 32, 128), dtype=jnp.float32)
    out2 = jax.block_until_ready(gradient_norm(x2, tile_h=8))
    ref2 = _reference(x2)
    assert jnp.allclose(out2, ref2, atol=1e-5, rtol=1e-5), "mismatch vs reference (multi tile)"

    print("KERNEL_OK")
</pallas_src>

<mosaic_0001>
module attributes {stable_mosaic.version = 11 : i64} {
  func.func @_grad_norm_tiled_kernel(%arg0: i32, %arg1: i32, %arg2: memref<1x16x16xf32, #tpu.memory_space<vmem>>, %arg3: memref<1x8x16xf32, #tpu.memory_space<vmem>>, %arg4: memref<1x8x16xf32, #tpu.memory_space<vmem>>, %arg5: memref<1x16x16xf32, #tpu.memory_space<vmem>>) attributes {dimension_semantics = [#tpu.dimension_semantics<parallel>, #tpu.dimension_semantics<parallel>], iteration_bounds = array<i64: 2, 1>, scalar_prefetch = 0 : i64, scratch_operands = 0 : i64, tpu.core_type = #tpu.core_type<tc>, window_params = [{transform_indices = @transform_0, window_bounds = array<i64: 1, 16, 16>}, {transform_indices = @transform_1, window_bounds = array<i64: 1, 8, 16>}, {transform_indices = @transform_2, window_bounds = array<i64: 1, 8, 16>}, {transform_indices = @transform_3, window_bounds = array<i64: 1, 16, 16>}]} {
    %c0 = arith.constant 0 : index
    %c0_0 = arith.constant 0 : index
    %c0_1 = arith.constant 0 : index
    %0 = vector.load %arg2[%c0, %c0_0, %c0_1] : memref<1x16x16xf32, #tpu.memory_space<vmem>>, vector<1x16x16xf32>
    %1 = vector.shape_cast %0 : vector<1x16x16xf32> to vector<16x16xf32>
    %c0_2 = arith.constant 0 : index
    %c0_3 = arith.constant 0 : index
    %c0_4 = arith.constant 0 : index
    %2 = vector.load %arg3[%c0_2, %c0_3, %c0_4] : memref<1x8x16xf32, #tpu.memory_space<vmem>>, vector<1x8x16xf32>
    %3 = vector.shape_cast %2 : vector<1x8x16xf32> to vector<8x16xf32>
    %c0_5 = arith.constant 0 : index
    %c0_6 = arith.constant 0 : index
    %c0_7 = arith.constant 0 : index
    %4 = vector.load %arg4[%c0_5, %c0_6, %c0_7] : memref<1x8x16xf32, #tpu.memory_space<vmem>>, vector<1x8x16xf32>
    %5 = vector.shape_cast %4 : vector<1x8x16xf32> to vector<8x16xf32>
    %c0_i32 = arith.constant 0 : i32
    %6 = arith.cmpi sgt, %arg1, %c0_i32 : i32
    %7 = vector.extract_strided_slice %3 {offsets = [7, 0], sizes = [1, 16], strides = [1, 1]} : vector<8x16xf32> to vector<1x16xf32>
    %8 = vector.extract_strided_slice %3 {offsets = [0, 0], sizes = [1, 16], strides = [1, 1]} : vector<8x16xf32> to vector<1x16xf32>
    %9 = arith.select %6, %7, %8 : vector<1x16xf32>
    %c0_i32_8 = arith.constant 0 : i32
    %10 = arith.cmpi slt, %arg1, %c0_i32_8 : i32
    %11 = vector.extract_strided_slice %5 {offsets = [0, 0], sizes = [1, 16], strides = [1, 1]} : vector<8x16xf32> to vector<1x16xf32>
    %12 = vector.extract_strided_slice %5 {offsets = [7, 0], sizes = [1, 16], strides = [1, 1]} : vector<8x16xf32> to vector<1x16xf32>
    %13 = arith.select %10, %11, %12 : vector<1x16xf32>
    %14 = vector.extract_strided_slice %1 {offsets = [0, 0], sizes = [15, 16], strides = [1, 1]} : vector<16x16xf32> to vector<15x16xf32>
    %15 = tpu.concatenate %9, %14 in 0 : vector<1x16xf32>, vector<15x16xf32> -> vector<16x16xf32>
    %16 = vector.extract_strided_slice %1 {offsets = [1, 0], sizes = [15, 16], strides = [1, 1]} : vector<16x16xf32> to vector<15x16xf32>
    %17 = tpu.concatenate %16, %13 in 0 : vector<15x16xf32>, vector<1x16xf32> -> vector<16x16xf32>
    %18 = vector.extract_strided_slice %1 {offsets = [0, 0], sizes = [16, 1], strides = [1, 1]} : vector<16x16xf32> to vector<16x1xf32>
    %19 = vector.extract_strided_slice %1 {offsets = [0, 0], sizes = [16, 15], strides = [1, 1]} : vector<16x16xf32> to vector<16x15xf32>
    %20 = tpu.concatenate %18, %19 in 1 : vector<16x1xf32>, vector<16x15xf32> -> vector<16x16xf32>
    %21 = vector.extract_strided_slice %1 {offsets = [0, 1], sizes = [16, 15], strides = [1, 1]} : vector<16x16xf32> to vector<16x15xf32>
    %22 = vector.extract_strided_slice %1 {offsets = [0, 15], sizes = [16, 1], strides = [1, 1]} : vector<16x16xf32> to vector<16x1xf32>
    %23 = tpu.concatenate %21, %22 in 1 : vector<16x15xf32>, vector<16x1xf32> -> vector<16x16xf32>
    %24 = arith.subf %23, %20 : vector<16x16xf32>
    %cst = arith.constant 5.000000e-01 : f32
    %25 = vector.broadcast %cst : f32 to vector<16x16xf32>
    %26 = arith.mulf %25, %24 : vector<16x16xf32>
    %27 = arith.subf %15, %17 : vector<16x16xf32>
    %cst_9 = arith.constant 5.000000e-01 : f32
    %28 = vector.broadcast %cst_9 : f32 to vector<16x16xf32>
    %29 = arith.mulf %28, %27 : vector<16x16xf32>
    %30 = arith.mulf %26, %26 : vector<16x16xf32>
    %31 = arith.mulf %29, %29 : vector<16x16xf32>
    %32 = arith.addf %30, %31 : vector<16x16xf32>
    %cst_10 = arith.constant 9.99999997E-7 : f32
    %33 = vector.broadcast %cst_10 : f32 to vector<16x16xf32>
    %34 = arith.addf %32, %33 : vector<16x16xf32>
    %35 = math.sqrt %34 : vector<16x16xf32>
    %c0_11 = arith.constant 0 : index
    %c0_12 = arith.constant 0 : index
    %c0_13 = arith.constant 0 : index
    %36 = vector.load %arg5[%c0_11, %c0_12, %c0_13] : memref<1x16x16xf32, #tpu.memory_space<vmem>>, vector<1x16x16xf32>
    %37 = vector.shape_cast %36 : vector<1x16x16xf32> to vector<16x16xf32>
    %38 = vector.shape_cast %35 : vector<16x16xf32> to vector<1x16x16xf32>
    tpu.vector_store %arg5[%c0_11, %c0_12, %c0_13], %38 {strides = array<i32>} : memref<1x16x16xf32, #tpu.memory_space<vmem>>, vector<1x16x16xf32>,
    return
  }
  func.func @transform_0(%arg0: i32, %arg1: i32) -> (i32, i32, i32) {
    %c0_i32 = arith.constant 0 : i32
    %c0_i32_0 = arith.constant 0 : i32
    return %arg0, %arg1, %c0_i32 : i32, i32, i32
  }
  func.func @transform_1(%arg0: i32, %arg1: i32) -> (i32, i32, i32) {
    %c2_i32 = arith.constant 2 : i32
    %0 = arith.muli %arg1, %c2_i32 : i32
    %c1_i32 = arith.constant 1 : i32
    %1 = arith.subi %0, %c1_i32 : i32
    %c0_i32 = arith.constant 0 : i32
    %2 = arith.maxsi %1, %c0_i32 : i32
    %c0_i32_0 = arith.constant 0 : i32
    %c0_i32_1 = arith.constant 0 : i32
    return %arg0, %2, %c0_i32_0 : i32, i32, i32
  }
  func.func @transform_2(%arg0: i32, %arg1: i32) -> (i32, i32, i32) {
    %c1_i32 = arith.constant 1 : i32
    %0 = arith.addi %arg1, %c1_i32 : i32
    %c2_i32 = arith.constant 2 : i32
    %1 = arith.muli %0, %c2_i32 : i32
    %c1_i32_0 = arith.constant 1 : i32
    %2 = arith.minsi %1, %c1_i32_0 : i32
    %c0_i32 = arith.constant 0 : i32
    %c0_i32_1 = arith.constant 0 : i32
    return %arg0, %2, %c0_i32 : i32, i32, i32
  }
  func.func @transform_3(%arg0: i32, %arg1: i32) -> (i32, i32, i32) {
    %c0_i32 = arith.constant 0 : i32
    %c0_i32_0 = arith.constant 0 : i32
    return %arg0, %arg1, %c0_i32 : i32, i32, i32
  }
}

</mosaic_0001>

<bundles_post_ra>
// kernel: tpu_custom_call.1
= control target key start
LH: loop header
LB: loop body
LE: loop exit
PB: predicated region body
PF: predicated region fallthrough
CT: control target
= control target key end

     0   :  { %s1149_s0 = inlined_call_operand.hbm [shape: f32[2,16,16], index: 0, kind: input, shape index: {}]   ;;  %s1150_s1 = inlined_call_operand.hbm [shape: f32[2,16,16], index: 1, kind: input, shape index: {}]   ;;  %s1151_s2 = inlined_call_operand.hbm [shape: f32[2,16,16], index: 2, kind: input, shape index: {}]   ;;  %s1152_s3 = inlined_call_operand.hbm [shape: f32[2,16,16], index: 3, kind: output, shape index: {}]  }
   0x1   :  { %1159 = sst [smem:[#allocation15_spill]] %s1149_s0 }
   0x2   :  { %1160 = sst [smem:[#allocation16_spill]] %s1150_s1 }
   0x3   :  { %8 = vsyncpa [#allocation3], 0 }
   0x4   :  { %10 = vsyncpa [#allocation3 + $0x1], 0 }
   0x5   :  { %11 = vsyncpa [#allocation6], 0 }
   0x6   :  { %13 = vsyncpa [#allocation6 + $0x1], 0 }
   0x7   :  { %14 = vsyncpa [#allocation4], 0 }
   0x8   :  { %16 = vsyncpa [#allocation4 + $0x1], 0  ;;  %s884_s12 = smov 0   ;;  %s886_s13 = smov 0  }
   0x9   :  { %s888_s14 = smov 0   ;;  %s890_s15 = smov 0  }
   0xa   :  { %s892_s16 = smov 0   ;;  %s894_s17 = smov 0  }
   0xb LB: > { %1161 = sst [smem:[#allocation12_spill]] %s848_s16  ;;  %s915_s18 = sadd.s32 4294967295, %s852_s17   ;;  %s852_s17 = sphi %s894_s17, %s22_s17   ;;  %s848_s16 = sphi %s892_s16, %s1182_s16   ;;  %s844_s15 = sphi %s890_s15, %s1181_s15   ;;  %s840_s14 = sphi %s888_s14, %s1185_s14   ;;  %s836_s13 = sphi %s886_s13, %s1184_s13   ;;  %s832_s12 = sphi %s884_s12, %s1183_s12  }
   0xc   : > { %s564_s19 = sadd.s32 4294967294, %s852_s17   ;;  %s34_s20 = sadd.s32 1, %s848_s16 }
   0xd   : > { %s43_s21 = sadd.s32 1, %s840_s14  ;;  %p36_p0 = scmp.ge.s32.totalorder %s34_s20, 2 }
   0xe   : > { %p50_p1 = scmp.ne.s32.totalorder %s840_s14, %s836_s13  ;;  %p51_p2 = scmp.eq.s32.totalorder %s852_s17, 0 }
   0xf   : > { %p56_p3 = scmp.ne.s32.totalorder %s836_s13, %s832_s12  ;;  %s1187_s20 = smov (%p36_p0, %s34_s20), 0 }
  0x10   : > { %1162 = sst [smem:[#allocation13_spill]] %s1187_s20  ;;  %p927_p4 = por %p51_p2, %p50_p1 }
  0x11   : > { %p57_p5 = scmp.eq.s32.totalorder %s915_s18, 0  ;;  %s38_s23 = ssub.s32 %s848_s16, %s1187_s20 }
  0x12   : > { %p154_p6 = scmp.eq.s32.totalorder %s915_s18, 1  ;;  %p41_p7 = scmp.eq.s32.totalorder %s38_s23, 0 }
  0x13   : > { %p935_p8 = por %p57_p5, %p56_p3  ;;  %p160_p10 = scmp.eq.s32.totalorder %s564_s19, 1 }
  0x14   : > { %p939_p9 = por %p154_p6, %p50_p1  ;;  %p616_p13 = scmp.lt.s32.totalorder %s852_s17, 2 }
  0x15   : > { %s1164_s24 = scalar_select %p935_p8, 1, 0 }
  0x16   : > { %s1165_s25 = scalar_select %p939_p9, 1, 0 }
  0x17   : > { %s944_s26 = scalar_select %p41_p7, %s840_s14, %s43_s21  }
  0x18   : > { %p946_p11 = por %p160_p10, %p56_p3  ;;  %s953_s28 = sand.u32 1, %s840_s14  }
  0x19   : > { %1166 = sst [smem:[#allocation14_spill]] %s944_s26  ;;  %s956_s29 = sshll.u32 %s848_s16, 8 }
  0x1a   : > { %s1167_s27 = scalar_select %p946_p11, 1, 0 }
  0x1b   : > { %s203_s30 = sand.u32 1, %s852_s17   ;;  %s1168_s0 = sld [smem:[#allocation15_spill]] }
  0x1c   : > { %p967_p0 = pnand %p616_p13, %p927_p4  ;;  %s1153_s8 = sshll.u32 %s953_s28, 3 }
  0x1d   : > { %s1170_s1 = sld [smem:[#allocation16_spill]]  ;;  %s207_s19 = scalar_lea.vmem [#allocation5], %s1153_s8 }
  0x1e   : > { %s1169_s7 = scalar_select %p967_p0, 1, 0 }
  0x1f   : > { %s220_s21 = sshll.u32 %s207_s19, 4  ;;  %s982_s22 = scalar_lea.sflag [#allocation6], %s203_s30  ;;  %s980_s21 = int_to_ptr.vmem [resolvable:$true] %s220_s21 }
  0x20   : > { %p988_p2 = pneg %p967_p0 }
  0x21   : > { %s963_s6 = scalar_lea.hbm %s1168_s0, %s956_s29 }
  0x23   : > { %s976_s11 = scalar_lea.hbm %s1170_s1, %s956_s29  ;;  %s681_s10 = scalar_lea.hbm %s1170_s1, 512 }
  0x24   : > { %s676_s23 = scalar_lea.hbm %s976_s11, 128  ;;  %p682_p5 = scmp.lt.u32.totalorder %s976_s11, %s1170_s1 }
  0x25   : > { %p677_p1 = scmp.ne.s32.totalorder %s976_s11, %s676_s23  ;;  %p683_p6 = scmp.lt.u32.totalorder %s681_s10, %s676_s23 }
  0x26   : > { %p685_p10 = scmp.lt.u32.totalorder %s676_s23, %s976_s11 }
  0x27   : > { %p679_p3 = pnand %p988_p2, %p677_p1  ;;  %p684_p7 = por %p683_p6, %p682_p5 }
  0x29   : > { %p680_p4 = pneg %p679_p3  ;;  %p686_p13 = por %p685_p10, %p684_p7 }
  0x2b   : > { %p687_p12 = pnand %p686_p13, %p680_p4 }
  0x2d   : > { %690 = shalt.err (!%p687_p12)
}
  0x2e   : > { %s691_s30 = scalar_lea.vmem %s980_s21, 128  ;;  %s854_s5 = smov [#allocation5]  }
  0x2f   : > { %p692_p1 = scmp.ne.s32.totalorder %s980_s21, %s691_s30  ;;  %s696_s9 = sshll.u32 %s854_s5, 4  ;;  %s697_s9 = int_to_ptr.vmem [resolvable:$false] %s696_s9 }
  0x30   : > { %s698_s8 = scalar_lea.vmem %s697_s9, 256  ;;  %p699_p9 = scmp.lt.s32.totalorder %s980_s21, %s697_s9 }
  0x31   : > { %p694_p3 = pnand %p692_p1, %p988_p2  ;;  %p700_p8 = scmp.lt.s32.totalorder %s698_s8, %s691_s30 }
  0x33   : > { %p695_p11 = pneg %p694_p3  ;;  %p701_p5 = por %p700_p8, %p699_p9 }
  0x35   : > { %p702_p6 = pnand %p701_p5, %p695_p11 }
  0x37   : > { %705 = shalt.err (!%p702_p6)
}
  0x38   : > { %608 = dma.hbm_to_vmem [thread:$0]  (!%p967_p0), %s976_s11, 128, %s980_s21, %s982_s22  }
  0x39   : > { %p576_p12 = scmp.ge.s32.totalorder %s852_s17, 1  ;;  %p249_p4 = scmp.lt.s32.totalorder %s852_s17, 3 }
  0x3a   : > { %s567_s10 = sshll.u32 %s953_s28, 4  ;;  %s591_s5 = sadd.s32 128, %s956_s29 }
  0x3b   : > { %p1014_p8 = pnand %p576_p12, %p249_p4  ;;  %s184_s19 = scalar_lea.vmem [#allocation2], %s567_s10 }
  0x3c   : > { %s193_s30 = sshll.u32 %s184_s19, 4  ;;  %s1025_s1 = scalar_lea.hbm %s1151_s2, %s591_s5  ;;  %s1020_s30 = int_to_ptr.vmem [resolvable:$true] %s193_s30 }
  0x3d   : > { %s1172_s23 = scalar_select %p1014_p8, 1, 0 }
  0x3e   : > { %s181_s11 = scalar_lea.sflag [#allocation3], %s953_s28  ;;  %s706_s21 = scalar_lea.hbm %s963_s6, 256 }
  0x3f   : > { %p707_p9 = scmp.ne.s32.totalorder %s963_s6, %s706_s21  ;;  %s711_s26 = scalar_lea.hbm %s1168_s0, 512 }
  0x40   : > { %p712_p10 = scmp.lt.u32.totalorder %s963_s6, %s1168_s0  ;;  %p713_p13 = scmp.lt.u32.totalorder %s711_s26, %s706_s21 }
  0x41   : > { %p709_p11 = pnand %p707_p9, %p988_p2  ;;  %p715_p3 = scmp.lt.u32.totalorder %s706_s21, %s963_s6 }
  0x42   : > { %p714_p1 = por %p713_p13, %p712_p10 }
  0x43   : > { %p710_p7 = pneg %p709_p11 }
  0x44   : > { %p716_p5 = por %p715_p3, %p714_p1 }
  0x46   : > { %p717_p6 = pnand %p716_p5, %p710_p7 }
  0x48   : > { %720 = shalt.err (!%p717_p6)
}
  0x49   : > { %s721_s29 = scalar_lea.vmem %s1020_s30, 256  ;;  %s855_s16 = smov [#allocation2]  }
  0x4a   : > { %p722_p12 = scmp.ne.s32.totalorder %s1020_s30, %s721_s29  ;;  %s726_s20 = sshll.u32 %s855_s16, 4  ;;  %s727_s20 = int_to_ptr.vmem [resolvable:$false] %s726_s20 }
  0x4b   : > { %s728_s5 = scalar_lea.vmem %s727_s20, 512  ;;  %p729_p11 = scmp.lt.s32.totalorder %s1020_s30, %s727_s20 }
  0x4c   : > { %p724_p4 = pnand %p722_p12, %p988_p2  ;;  %p730_p8 = scmp.lt.s32.totalorder %s728_s5, %s721_s29 }
  0x4e   : > { %p725_p9 = pneg %p724_p4  ;;  %p731_p10 = por %p730_p8, %p729_p11 }
  0x50   : > { %p732_p13 = pnand %p731_p10, %p725_p9 }
  0x52   : > { %735 = shalt.err (!%p732_p13)
}
  0x53   : > { %s856_s26 = smov 128   ;;  %s857_s9 = smov 8  }
  0x54   : > { %605 = dma.hbm_to_vmem [thread:$0]  (!%p967_p0), %s963_s6, 256, %s1020_s30, %s181_s11, %s856_s26, %s856_s26, %s857_s9  }
  0x55   : > { %s1173_s8 = sshll.u32 %s953_s28, 3  ;;  %s736_s19 = scalar_lea.hbm %s1025_s1, 128 }
  0x56   : > { %s231_s21 = scalar_lea.vmem [#allocation7], %s1173_s8  ;;  %p737_p8 = scmp.ne.s32.totalorder %s1025_s1, %s736_s19 }
  0x57   : > { %s244_s10 = sshll.u32 %s231_s21, 4  ;;  %s741_s20 = scalar_lea.hbm %s1151_s2, 512  ;;  %s245_s10 = int_to_ptr.vmem [resolvable:$true] %s244_s10 }
  0x58   : > { %p739_p7 = pnand %p737_p8, %p988_p2  ;;  %p742_p3 = scmp.lt.u32.totalorder %s1025_s1, %s1151_s2 }
  0x59   : > { %p743_p5 = scmp.lt.u32.totalorder %s741_s20, %s736_s19  ;;  %p745_p12 = scmp.lt.u32.totalorder %s736_s19, %s1025_s1 }
  0x5a   : > { %p740_p1 = pneg %p739_p7 }
  0x5b   : > { %p744_p6 = por %p743_p5, %p742_p3 }
  0x5d   : > { %p746_p4 = por %p745_p12, %p744_p6 }
  0x5f   : > { %p747_p9 = pnand %p746_p4, %p740_p1 }
  0x61   : > { %750 = shalt.err (!%p747_p9)
}
  0x62   : > { %s751_s28 = scalar_lea.vmem %s245_s10, 128  ;;  %s858_s6 = smov [#allocation7]  }
  0x63   : > { %p752_p11 = scmp.ne.s32.totalorder %s245_s10, %s751_s28  ;;  %s756_s30 = sshll.u32 %s858_s6, 4  ;;  %s757_s30 = int_to_ptr.vmem [resolvable:$false] %s756_s30 }
  0x64   : > { %s758_s11 = scalar_lea.vmem %s757_s30, 256  ;;  %p759_p8 = scmp.lt.s32.totalorder %s245_s10, %s757_s30 }
  0x65   : > { %p754_p10 = pnand %p752_p11, %p988_p2  ;;  %p760_p7 = scmp.lt.s32.totalorder %s758_s11, %s751_s28 }
  0x67   : > { %p755_p13 = pneg %p754_p10  ;;  %p761_p0 = por %p760_p7, %p759_p8 }
  0x69   : > { %p762_p3 = pnand %p761_p0, %p755_p13 }
  0x6b   : > { %765 = shalt.err (!%p762_p3)
}
  0x6c   : > { %p1174_p5 = scmp.ne.s32.totalorder %s1169_s7, 0  ;;  %p1175_p1 = scmp.ne.s32.totalorder %s1172_s23, 0 }
  0x6d   : > { %s1074_s0 = sand.u32 (!%p1175_p1), 1, %s836_s13   ;;  %p1176_p0 = scmp.ne.s32.totalorder (!%p1175_p1), %s1164_s24, 0 }
  0x6e   : > { %611 = dma.hbm_to_vmem [thread:$0]  (!%p1174_p5), %s1025_s1, 128, %s245_s10, %s982_s22  }
  0x6f   : > { %253 = sbr.rel (%p1175_p1) target bundleno = 283 (0x11b), region = 32  ;;  %s577_s4 = sshll.u32 (!%p1175_p1), %s1074_s0, 4 }
  0x70   : > { %s256_s26 = scalar_lea.sflag (!%p1175_p1), [#allocation3], %s1074_s0  ;;  %s259_s9 = scalar_lea.vmem (!%p1175_p1), [#allocation2], %s577_s4 }
  0x76   : > { %819 = dma.done.wait (%p1176_p0), %s256_s26, 256  }
  0x77   : > { %821 = vsyncadd (%p1176_p0), %s256_s26, 4294967040  ;;  %s264_s1 = sand.u32 1, %s915_s18   ;;  %s578_s7 = sshll.u32 %s1074_s0, 3 }
  0x78   : > { %s265_s22 = scalar_lea.sflag [#allocation6], %s264_s1  ;;  %s268_s23 = scalar_lea.vmem [#allocation5], %s578_s7 }
  0x79   : > { %823 = dma.done.wait (%p1176_p0), %s265_s22, 256  }
  0x7a   : > { %825 = vsyncadd (%p1176_p0), %s265_s22, 4294967040  ;;  %v320_v0 = vld [vmem:[%s259_s9] sm:$0xff]  ;;  %s859_s8 = smov 127   ;;  %s860_s21 = smov 1   ;;  %v321_v1 = vld [vmem:[%s259_s9 + $0x8] sm:$0xff]  ;;  %vm345_vm0 = vcmask 1040384  }
  0x7b   : > { %371 = vrot.lane.b32.xlu1 %v320_v0, %s859_s8  ;;  %362 = vrot.lane.b32.xlu0 %v320_v0, %s860_s21  ;;  %v354_v2 = vrot.slane %v321_v1, 1  ;;  %v346_v3 = vrot.slane %v320_v0, 7  ;;  %v353_v4 = vrot.slane %v320_v0, 1  ;;  %v322_v5 = vld [vmem:[%s268_s23] sm:$0xff]  ;;  %vm352_vm1 = vcmask 1046528   ;;  %s277_s18 = scalar_lea.vmem [#allocation7], %s578_s7 }
  0x7c   : > { %v347_v8 = vrot.slane %v321_v1, 7  ;;  %v323_v9 = vld [vmem:[%s277_s18] sm:$0xff]  ;;  %vm377_vm2 = vcmask 121856   ;;  %vm368_vm3 = vcmask 7168   ;;  %vm410_vm5 = vcmask 130048   ;;  %s592_s24 = sshll.u32 %s844_s15, 8 }
  0x7d   : > { %v351_v6 = vsel %vm345_vm0, %v322_v5, %v346_v3  ;;  %v355_v7 = vsel %vm352_vm1, %v353_v4, %v354_v2  ;;  %v361_v11 = vsel %vm352_vm1, %v354_v2, %v323_v9  ;;  %s309_s10 = scalar_lea.vmem [#allocation8], %s577_s4  ;;  %s1097_s20 = scalar_lea.hbm %s1152_s3, %s592_s24 }
  0x7e   : > { %v384_v10 = vsub.f32 %v351_v6, %v355_v7  ;;  %v348_v12 = vsel %vm345_vm0, %v346_v3, %v347_v8  ;;  %s429_s19 = sshll.u32 %s309_s10, 4  ;;  %s414_s15 = scalar_lea.sflag [#allocation4], %s1074_s0  ;;  %s1099_s19 = int_to_ptr.vmem [resolvable:$true] %s429_s19 }
  0x7f   : > { %373 = vrot.lane.b32.xlu1 %v321_v1, %s859_s8  ;;  %364 = vrot.lane.b32.xlu0 %v321_v1, %s860_s21  ;;  %v385_v16 = vsub.f32 %v348_v12, %v361_v11  ;;  %s766_s5 = scalar_lea.vmem %s1099_s19, 256  ;;  %p1177_p6 = scmp.ne.s32.totalorder %s1165_s25, 0 }
  0x80   : > { %v386_v15 = vmul.f32 0.5, %v384_v10  ;;  %p767_p2 = scmp.ne.s32.totalorder %s1099_s19, %s766_s5  ;;  %s861_s28 = smov [#allocation8]  }
  0x81   : > { %v387_v24 = vmul.f32 0.5, %v385_v16  ;;  %s770_s6 = sshll.u32 %s861_s28, 4  ;;  %s771_s6 = int_to_ptr.vmem [resolvable:$false] %s770_s6 }
  0x82   : > { %v390_v21 = vmul.f32 %v386_v15, %v386_v15  ;;  %p768_p12 = pnand %p767_p2, %p1177_p6  ;;  %s772_s30 = scalar_lea.vmem %s771_s6, 512 }
  0x83   : > { %v391_v31 = vmul.f32 %v387_v24, %v387_v24  ;;  %p773_p9 = scmp.lt.s32.totalorder %s1099_s19, %s771_s6  ;;  %p774_p11 = scmp.lt.s32.totalorder %s772_s30, %s766_s5 }
  0x84   : > { %p769_p4 = pneg %p768_p12 }
  0x85   : > { %p775_p10 = por %p774_p11, %p773_p9 }
  0x87   : > { %p776_p13 = pnand %p775_p10, %p769_p4 }
  0xed   : > { %v372_v13 = vpop.permute.xlu1 %371  ;;  %v363_v14 = vpop.permute.xlu0 %362 }
  0xee   : > { %v378_v17 = vsel %vm377_vm2, %v372_v13, %v320_v0  ;;  %v369_v18 = vsel %vm368_vm3, %v320_v0, %v363_v14 }
  0xef   : > { %v380_v19 = vsub.f32 %v378_v17, %v369_v18 }
  0xf1   : > { %v382_v20 = vmul.f32 0.5, %v380_v19  ;;  %v374_v22 = vpop.permute.xlu1 %373  ;;  %v365_v23 = vpop.permute.xlu0 %364 }
  0xf2   : > { %v379_v25 = vsel %vm377_vm2, %v374_v22, %v321_v1  ;;  %v370_v26 = vsel %vm368_vm3, %v321_v1, %v365_v23 }
  0xf3   : > { %v388_v27 = vmul.f32 %v382_v20, %v382_v20  ;;  %v381_v28 = vsub.f32 %v379_v25, %v370_v26 }
  0xf5   : > { %v392_v29 = vadd.f32 %v390_v21, %v388_v27  ;;  %v383_v30 = vmul.f32 0.5, %v381_v28 }
  0xf7   : > { %v394_v32 = vadd.f32 1e-06, %v392_v29  ;;  %v389_v33 = vmul.f32 %v383_v30, %v383_v30 }
  0xf9   : > { %672 = vrsqrt.f32 %v394_v32  ;;  %v393_v34 = vadd.f32 %v391_v31, %v389_v33  ;;  %vm398_vm4 = vcmp.eq.f32.partialorder %v394_v32, inf  ;;  %v401_v38 = vand.u32 2147483648, %v394_v32 }
  0xfa   : > { %vm400_vm6 = vcmp.eq.f32.partialorder %v394_v32, 0.0 }
  0xfb   : > { %v395_v35 = vadd.f32 1e-06, %v393_v34 }
  0xfd   : > { %674 = vrsqrt.f32 %v395_v35  ;;  %vm405_vm7 = vcmp.eq.f32.partialorder %v395_v35, inf  ;;  %v408_v43 = vand.u32 2147483648, %v395_v35  ;;  %vm407_vm8 = vcmp.eq.f32.partialorder %v395_v35, 0.0 }
 0x103   : > { %v673_v36 = vpop.eup %672 }
 0x104   : > { %v397_v37 = vmul.f32 %v673_v36, %v394_v32 }
 0x106   : > { %v399_v39 = vsel %vm398_vm4, %v394_v32, %v397_v37 }
 0x107   : > { %v675_v40 = vpop.eup %674  ;;  %v402_v41 = vsel %vm400_vm6, %v401_v38, %v399_v39 }
 0x108   : > { %v404_v42 = vmul.f32 %v675_v40, %v395_v35  ;;  %411 = vst.msk [vmem:[%s309_s10] sm:$0xff] %vm410_vm5, %v402_v41 }
 0x10a   : > { %v406_v44 = vsel %vm405_vm7, %v395_v35, %v404_v42 }
 0x10b   : > { %v409_v45 = vsel %vm407_vm8, %v408_v43, %v406_v44 }
 0x10c   : > { %412 = vst.msk [vmem:[%s309_s10 + $0x8] sm:$0xff] %vm410_vm5, %v409_v45 }
 0x10d   : > { %779 = shalt.err (!%p776_p13)
}
 0x10e   : > { %s780_s11 = scalar_lea.hbm %s1097_s20, 256  ;;  %s784_s9 = scalar_lea.hbm %s1152_s3, 512 }
 0x10f   : > { %p781_p8 = scmp.ne.s32.totalorder %s1097_s20, %s780_s11  ;;  %p785_p5 = scmp.lt.u32.totalorder %s1097_s20, %s1152_s3 }
 0x110   : > { %p786_p1 = scmp.lt.u32.totalorder %s784_s9, %s780_s11  ;;  %p788_p2 = scmp.lt.u32.totalorder %s780_s11, %s1097_s20 }
 0x111   : > { %p782_p7 = pnand %p781_p8, %p1177_p6 }
 0x112   : > { %p787_p0 = por %p786_p1, %p785_p5 }
 0x113   : > { %p783_p3 = pneg %p782_p7 }
 0x114   : > { %p789_p12 = por %p788_p2, %p787_p0 }
 0x116   : > { %p790_p4 = pnand %p789_p12, %p783_p3 }
 0x118   : > { %793 = shalt.err (!%p790_p4)
}
 0x119   : > { %s862_s22 = smov 128   ;;  %s863_s23 = smov 8  }
 0x11a   : > { %600 = dma.vmem_to_hbm [thread:$0]  (%p1177_p6), %s1099_s19, 256, %s1097_s20, %s414_s15, %s862_s22, %s862_s22, %s863_s23  }
 0x11b PF: > { %s444_s8 = sand.u32 1, %s832_s12   ;;  %p1178_p9 = scmp.ne.s32.totalorder %s1167_s27, 0 }
 0x11c   : > { %p1179_p11 = scmp.ge.s32.totalorder %s852_s17, 2  ;;  %s445_s21 = scalar_lea.sflag [#allocation4], %s444_s8 }
 0x11e   : > { %p613_p10 = pnand %p1179_p11, %p1178_p9 }
 0x120   : > { %827 = dma.done.wait (!%p613_p10), %s445_s21, 256  }
 0x121   : > { %829 = vsyncadd (!%p613_p10), %s445_s21, 4294967040  ;;  %s22_s17 = sadd.s32 1, %s852_s17   ;;  %s1180_s18 = sld [smem:[#allocation14_spill]] }
 0x122   : > { %p19_p13 = scmp.ge.s32.totalorder %s22_s17, 4   ;;  %s1181_s15 = sld [smem:[#allocation12_spill]] }
 0x123   : > { %s1182_s16 = sld [smem:[#allocation13_spill]]  ;;  %s1183_s12 = smov %s836_s13 }
 0x124   : > { %s1184_s13 = smov %s840_s14  ;;  %21 = sbr.rel (!%p19_p13) target bundleno = 11 (0xb), region = 101 }
 0x127   : > { %s1185_s14 = smov %s1180_s18 }
 0x12b   :  { %450 = vsyncpa [#allocation3], 1 }
 0x12c   :  { %452 = vsyncpa [#allocation3 + $0x1], 1 }
 0x12d   :  { %453 = vsyncpa [#allocation6], 1 }
 0x12e   :  { %455 = vsyncpa [#allocation6 + $0x1], 1 }
 0x12f   :  { %456 = vsyncpa [#allocation4], 1 }
 0x130   :  { %458 = vsyncpa [#allocation4 + $0x1], 1 }

</bundles_post_ra>
